<compile_context>
chip_gen: v7x
topology: tpu7x:2x2x1
jax: 0.10.0
libtpu: 0.0.40
codegen_flags: <defaults>
</compile_context>

<pallas_src>
import functools

import jax
import jax.numpy as jnp
from jax.experimental import pallas as pl
from jax.experimental.pallas import tpu as pltpu


def _round_up(x, m):
    return ((x + m - 1) // m) * m


def _tpu_vmem_capacity_bytes():
    try:
        return int(pltpu.get_tpu_info().vmem_capacity_bytes)
    except Exception:
        # Conservative fallback (v7x-sized physical VMEM) if the query fails.
        return 64 * 1024 * 1024


def _vmem_limit_bytes():
    # Explicit scoped-VMEM request: half of physical, capped at 64 MiB.
    #   v5e/v6e (128 MiB phys) -> 64 MiB (raises the 16/32 MiB defaults)
    #   v7x     (64 MiB phys)  -> 32 MiB (keeps double-buffering alive)
    return min(_tpu_vmem_capacity_bytes() // 2, 64 * 1024 * 1024)


def _pick_block_batch(n, c, in_itemsize, row_align):
    """Largest batch tile that keeps 2x-buffered DMA + f32 working set in VMEM."""
    budget = int(_vmem_limit_bytes() * 0.6)          # headroom for intermediates
    per_row = 2 * (c * in_itemsize + 4) + 3 * c * 4 + 32
    bb = budget // per_row
    bb = max(row_align, min(bb, 4096))               # thousands of rows max
    bb = (bb // row_align) * row_align
    return min(bb, _round_up(n, row_align))


def _focal_loss_kernel(logits_ref, targets_ref, out_ref, *,
                       alpha, gamma, block_batch, n_valid, reduce):
    x = logits_ref[...].astype(jnp.float32)                   # (TB, C)
    t = targets_ref[...]                                      # (TB, 1) int32

    # Numerically-stable log-softmax pieces, everything relative to row max m.
    m = jnp.max(x, axis=-1, keepdims=True)                    # (TB, 1)
    z = x - m                                                  # (TB, C)
    sumexp = jnp.sum(jnp.exp(z), axis=-1, keepdims=True)       # (TB, 1)

    # Gather target logit (relative to m) by masking z directly — no second
    # full-width multiply against x.
    col = jax.lax.broadcasted_iota(jnp.int32, x.shape, 1)      # (TB, C)
    tgt_z = jnp.sum(jnp.where(col == t, z, 0.0), axis=-1, keepdims=True)

    # ce = logsumexp(x) - x[target]; clamp tiny negative rounding to 0 so the
    # focal weight never sees 1 - pt < 0.
    ce = jnp.maximum(jnp.log(sumexp) - tgt_z, 0.0)             # (TB, 1)
    pt = jnp.exp(-ce)
    omp = 1.0 - pt
    if gamma == 2.0:
        w = omp * omp                                          # no exp/log pow
    elif gamma == 1.0:
        w = omp
    elif gamma == 0.0:
        w = jnp.ones_like(omp)
    else:
        w = omp ** gamma
    focal = w * ce
    if alpha != 1.0:
        focal = alpha * focal

    # Mask rows that are pure batch padding so they contribute nothing.
    row = (pl.program_id(0) * block_batch
           + jax.lax.broadcasted_iota(jnp.int32, (block_batch, 1), 0))
    focal = jnp.where(row < n_valid, focal, 0.0)

    if reduce:
        # Per-block partial sum: row 0 of this block's (8, 1) output slot
        # carries the sum, rows 1..7 are zero (so a plain jnp.sum outside
        # recovers the total).  No sequential accumulator -> grid is parallel.
        psum = jnp.sum(focal, keepdims=True)                   # (1, 1)
        slot = jax.lax.broadcasted_iota(jnp.int32, (8, 1), 0)
        out_ref[...] = jnp.where(slot == 0, psum, 0.0)
    else:
        out_ref[...] = focal


def focal_loss(logits, targets, *, alpha=1.0, gamma=2.0, reduce=True,
               block_batch=None):
    """Pallas implementation of FocalLoss.forward.

    logits:  (N, C) float
    targets: (N,)   int class indices in [0, C)
    Returns a scalar (reduce=True) or per-sample losses of shape (N,).
    """
    N, C = logits.shape
    in_itemsize = jnp.dtype(logits.dtype).itemsize
    row_align = max(8, 32 // in_itemsize)          # 8 for f32, 16 for bf16

    if block_batch is None:
        block_batch = _pick_block_batch(N, C, in_itemsize, row_align)
    block_batch = max(row_align, (int(block_batch) // row_align) * row_align)
    block_batch = min(block_batch, _round_up(N, row_align))

    n_pad = _round_up(N, block_batch)
    num_blocks = n_pad // block_batch

    targets2d = targets.astype(jnp.int32).reshape(N, 1)
    if n_pad != N:
        logits = jnp.pad(logits, ((0, n_pad - N), (0, 0)))
        targets2d = jnp.pad(targets2d, ((0, n_pad - N), (0, 0)))

    kernel = functools.partial(
        _focal_loss_kernel,
        alpha=float(alpha),
        gamma=float(gamma),
        block_batch=block_batch,
        n_valid=N,
        reduce=bool(reduce),
    )

    if reduce:
        # One (8, 1) slot per grid step holding that step's partial sum.
        out_shape = jax.ShapeDtypeStruct((num_blocks * 8, 1), jnp.float32)
        out_spec = pl.BlockSpec((8, 1), lambda i: (i, 0))
    else:
        out_shape = jax.ShapeDtypeStruct((n_pad, 1), jnp.float32)
        out_spec = pl.BlockSpec((block_batch, 1), lambda i: (i, 0))

    out = pl.pallas_call(
        kernel,
        out_shape=out_shape,
        grid_spec=pltpu.PrefetchScalarGridSpec(
            num_scalar_prefetch=0,
            grid=(num_blocks,),
            in_specs=[
                pl.BlockSpec((block_batch, C), lambda i: (i, 0)),
                pl.BlockSpec((block_batch, 1), lambda i: (i, 0)),
            ],
            out_specs=out_spec,
        ),
        compiler_params=pltpu.CompilerParams(
            dimension_semantics=("parallel",),       # no cross-step dependence
            vmem_limit_bytes=_vmem_limit_bytes(),
        ),
    )(logits, targets2d)

    if reduce:
        return jnp.sum(out) / N
    return out[:N, 0]


def _focal_loss_ref(logits, targets, alpha=1.0, gamma=2.0, reduce=True):
    logp = jax.nn.log_softmax(logits.astype(jnp.float32), axis=-1)
    ce = -jnp.take_along_axis(logp, targets[:, None].astype(jnp.int32),
                              axis=-1)[:, 0]
    pt = jnp.exp(-ce)
    fl = alpha * (1.0 - pt) ** gamma * ce
    return jnp.mean(fl) if reduce else fl


if __name__ == "__main__":
    key = jax.random.PRNGKey(0)
    k1, k2, k3, k4 = jax.random.split(key, 4)

    # Small aligned case (batch=8, classes=32), reduced (scalar) output.
    N, C = 8, 32
    logits = jax.random.normal(k1, (N, C), dtype=jnp.float32)
    targets = jax.random.randint(k2, (N,), 0, C, dtype=jnp.int32)
    out = jax.block_until_ready(focal_loss(logits, targets, reduce=True))
    ref = _focal_loss_ref(logits, targets, reduce=True)
    assert jnp.allclose(out, ref, rtol=1e-5, atol=1e-5), (out, ref)

    # Unaligned batch/classes (exercises padding + in-kernel row masking),
    # both per-sample and reduced outputs.
    N2, C2 = 37, 19
    logits2 = jax.random.normal(k3, (N2, C2), dtype=jnp.float32)
    targets2 = jax.random.randint(k4, (N2,), 0, C2, dtype=jnp.int32)

    rows = jax.block_until_ready(focal_loss(logits2, targets2, reduce=False))
    rows_ref = _focal_loss_ref(logits2, targets2, reduce=False)
    assert rows.shape == (N2,)
    assert jnp.allclose(rows, rows_ref, rtol=1e-5, atol=1e-5)

    mean2 = jax.block_until_ready(focal_loss(logits2, targets2, reduce=True))
    mean2_ref = _focal_loss_ref(logits2, targets2, reduce=True)
    assert jnp.allclose(mean2, mean2_ref, rtol=1e-5, atol=1e-5), (mean2, mean2_ref)

    print("KERNEL_OK")
</pallas_src>

<mosaic_0001>
module attributes {stable_mosaic.version = 11 : i64} {
  func.func @_focal_loss_kernel(%arg0: i32, %arg1: memref<8x32xf32, #tpu.memory_space<vmem>>, %arg2: memref<8x1xi32, #tpu.memory_space<vmem>>, %arg3: memref<8x1xf32, #tpu.memory_space<vmem>>) attributes {dimension_semantics = [#tpu.dimension_semantics<parallel>], iteration_bounds = array<i64: 1>, scalar_prefetch = 0 : i64, scratch_operands = 0 : i64, tpu.core_type = #tpu.core_type<tc>, window_params = [{transform_indices = @transform_0, window_bounds = array<i64: 8, 32>}, {transform_indices = @transform_1, window_bounds = array<i64: 8, 1>}, {transform_indices = @transform_2, window_bounds = array<i64: 8, 1>}]} {
    %c0 = arith.constant 0 : index
    %c0_0 = arith.constant 0 : index
    %0 = vector.load %arg1[%c0, %c0_0] : memref<8x32xf32, #tpu.memory_space<vmem>>, vector<8x32xf32>
    %c0_1 = arith.constant 0 : index
    %c0_2 = arith.constant 0 : index
    %1 = vector.load %arg2[%c0_1, %c0_2] : memref<8x1xi32, #tpu.memory_space<vmem>>, vector<8x1xi32>
    %cst = arith.constant dense<0xFF800000> : vector<8xf32>
    %2 = vector.multi_reduction <maximumf>, %0, %cst [1] : vector<8x32xf32> to vector<8xf32>
    %3 = vector.shape_cast %2 : vector<8xf32> to vector<8x1xf32>
    %4 = vector.broadcast %3 : vector<8x1xf32> to vector<8x32xf32>
    %5 = arith.subf %0, %4 : vector<8x32xf32>
    %6 = math.exp %5 : vector<8x32xf32>
    %cst_3 = arith.constant dense<0.000000e+00> : vector<8xf32>
    %7 = vector.multi_reduction <add>, %6, %cst_3 [1] : vector<8x32xf32> to vector<8xf32>
    %8 = vector.shape_cast %7 : vector<8xf32> to vector<8x1xf32>
    %9 = tpu.iota {dimensions = array<i32: 1>} : vector<8x32xi32>
    %10 = vector.broadcast %1 : vector<8x1xi32> to vector<8x32xi32>
    %11 = arith.cmpi eq, %9, %10 : vector<8x32xi32>
    %cst_4 = arith.constant 0.000000e+00 : f32
    %12 = vector.broadcast %cst_4 : f32 to vector<8x32xf32>
    %13 = arith.select %11, %5, %12 : vector<8x32xi1>, vector<8x32xf32>
    %cst_5 = arith.constant dense<0.000000e+00> : vector<8xf32>
    %14 = vector.multi_reduction <add>, %13, %cst_5 [1] : vector<8x32xf32> to vector<8xf32>
    %15 = vector.shape_cast %14 : vector<8xf32> to vector<8x1xf32>
    %16 = math.log %8 : vector<8x1xf32>
    %17 = arith.subf %16, %15 : vector<8x1xf32>
    %cst_6 = arith.constant 0.000000e+00 : f32
    %18 = vector.broadcast %cst_6 : f32 to vector<8x1xf32>
    %19 = arith.maximumf %17, %18 : vector<8x1xf32>
    %cst_7 = arith.constant 0.000000e+00 : f32
    %20 = vector.broadcast %cst_7 : f32 to vector<8x1xf32>
    %21 = arith.subf %20, %19 : vector<8x1xf32>
    %22 = math.exp %21 : vector<8x1xf32>
    %cst_8 = arith.constant 1.000000e+00 : f32
    %23 = vector.broadcast %cst_8 : f32 to vector<8x1xf32>
    %24 = arith.subf %23, %22 : vector<8x1xf32>
    %25 = arith.mulf %24, %24 : vector<8x1xf32>
    %26 = arith.mulf %25, %19 : vector<8x1xf32>
    %c8_i32 = arith.constant 8 : i32
    %27 = arith.muli %arg0, %c8_i32 : i32
    %28 = tpu.iota {dimensions = array<i32: 0>} : vector<8x1xi32>
    %29 = vector.broadcast %27 : i32 to vector<8x1xi32>
    %30 = arith.addi %29, %28 : vector<8x1xi32>
    %c8_i32_9 = arith.constant 8 : i32
    %31 = vector.broadcast %c8_i32_9 : i32 to vector<8x1xi32>
    %32 = arith.cmpi slt, %30, %31 : vector<8x1xi32>
    %cst_10 = arith.constant 0.000000e+00 : f32
    %33 = vector.broadcast %cst_10 : f32 to vector<8x1xf32>
    %34 = arith.select %32, %26, %33 : vector<8x1xi1>, vector<8x1xf32>
    %35 = vector.shape_cast %34 : vector<8x1xf32> to vector<1x8x1xf32>
    %cst_11 = arith.constant dense<0.000000e+00> : vector<1xf32>
    %36 = vector.multi_reduction <add>, %35, %cst_11 [1, 2] : vector<1x8x1xf32> to vector<1xf32>
    %37 = vector.shape_cast %36 : vector<1xf32> to vector<1x1x1xf32>
    %38 = vector.extract %37[0, 0, 0] : f32 from vector<1x1x1xf32>
    %39 = vector.broadcast %38 : f32 to vector<1x1xf32>
    %40 = tpu.iota {dimensions = array<i32: 0>} : vector<8x1xi32>
    %c0_i32 = arith.constant 0 : i32
    %41 = vector.broadcast %c0_i32 : i32 to vector<8x1xi32>
    %42 = arith.cmpi eq, %40, %41 : vector<8x1xi32>
    %cst_12 = arith.constant 0.000000e+00 : f32
    %43 = vector.shape_cast %39 : vector<1x1xf32> to vector<1x1xf32>
    %44 = vector.broadcast %43 : vector<1x1xf32> to vector<8x1xf32>
    %45 = vector.broadcast %cst_12 : f32 to vector<8x1xf32>
    %46 = arith.select %42, %44, %45 : vector<8x1xi1>, vector<8x1xf32>
    %c0_13 = arith.constant 0 : index
    %c0_14 = arith.constant 0 : index
    %47 = vector.load %arg3[%c0_13, %c0_14] : memref<8x1xf32, #tpu.memory_space<vmem>>, vector<8x1xf32>
    tpu.vector_store %arg3[%c0_13, %c0_14], %46 {strides = array<i32>} : memref<8x1xf32, #tpu.memory_space<vmem>>, vector<8x1xf32>,
    return
  }
  func.func @transform_0(%arg0: i32) -> (i32, i32) {
    %c0_i32 = arith.constant 0 : i32
    %c0_i32_0 = arith.constant 0 : i32
    return %arg0, %c0_i32 : i32, i32
  }
  func.func @transform_1(%arg0: i32) -> (i32, i32) {
    %c0_i32 = arith.constant 0 : i32
    %c0_i32_0 = arith.constant 0 : i32
    return %arg0, %c0_i32 : i32, i32
  }
  func.func @transform_2(%arg0: i32) -> (i32, i32) {
    %c0_i32 = arith.constant 0 : i32
    %c0_i32_0 = arith.constant 0 : i32
    return %arg0, %c0_i32 : i32, i32
  }
}

</mosaic_0001>

<bundles_post_ra>
// kernel: tpu_custom_call.1
= control target key start
LH: loop header
LB: loop body
LE: loop exit
PB: predicated region body
PF: predicated region fallthrough
CT: control target
= control target key end

     0   :  { %vm13_vm0 = vcmask 261120   ;;  %v79_v1 = vmov 0   ;;  %v23_v7 = vlaneseq  ;;  %vm50_vm2 = vcmask 7168   ;;  %s109_s0 = inlined_call_operand.vmem [shape: f32[8,32], index: 0, kind: input, shape index: {}]   ;;  %s110_s1 = inlined_call_operand.vmem [shape: s32[8,1], index: 1, kind: input, shape index: {}]   ;;  %s111_s2 = inlined_call_operand.vmem [shape: f32[8,1], index: 2, kind: output, shape index: {}]  }
   0x1   :  { %v11_v0 = vld [vmem:[%s109_s0] sm:$0xff]  ;;  %72 = vset.pattern.permute.xlu0 %v79_v1 }
   0x2   :  { %v14_v2 = vsel %vm13_vm0, %v11_v0, -inf  ;;  %v12_v3 = vld [vmem:[%s110_s1] sm:$0xff]  ;;  %v24_v8 = vand.u32 127, %v23_v7  ;;  %v45_v34 = vshrl.u32 %v23_v7, 7 }
   0x3   :  { %15 = vmax.xlane.f32.xlu0 %v14_v2 }
   0x4   :  { %vm61_vm3 = vcmp.eq.s32.totalorder %v45_v34, 0 }
  0x19   :  { %26 = vperm.xlu0 %72, %v12_v3  }
  0x90   :  { %v16_v4 = vpop.xlane.xlu0 %15 }
  0x91   :  { %v17_v5 = vsub.f32 %v11_v0, %v16_v4 }
  0x93   :  { %v18_v6 = vmul.f32 1.442695, %v17_v5 }
  0x95   :  { %73 = vpow2.f32 %v18_v6 }
  0x98   :  { %v27_v9 = vpop.permute.xlu0 %26 }
  0x99   :  { %vm28_vm1 = vcmp.eq.s32.totalorder %v24_v8, %v27_v9 }
  0x9a   :  { %v29_v12 = vsel %vm28_vm1, %v17_v5, 0.0 }
  0x9b   :  { %v30_v13 = vsel %vm13_vm0, %v29_v12, 0.0 }
  0x9f   :  { %v74_v10 = vpop.eup %73 }
  0xa0   :  { %v20_v11 = vsel %vm13_vm0, %v74_v10, 0.0 }
  0xa1   :  { %21 = vadd.xlane.f32.xlu1 %v20_v11 }
  0xa5   :  { %31 = vadd.xlane.f32.xlu1 %v30_v13 }
 0x12e   :  { %v22_v14 = vpop.xlane.xlu1 %21 }
 0x12f   :  { %75 = vlog2.f32 %v22_v14 }
 0x132   :  { %v32_v17 = vpop.xlane.xlu1 %31 }
 0x139   :  { %v76_v15 = vpop.eup %75 }
 0x13a   :  { %v34_v16 = vmul.f32 0.6931472, %v76_v15 }
 0x13c   :  { %v35_v18 = vsub.f32 %v34_v16, %v32_v17 }
 0x13e   :  { %v36_v19 = vmax.f32 %v35_v18, 0.0 }
 0x140   :  { %v37_v20 = vsub.f32 0.0, %v36_v19 }
 0x142   :  { %v38_v21 = vmul.f32 1.442695, %v37_v20 }
 0x144   :  { %77 = vpow2.f32 %v38_v21 }
 0x14e   :  { %v78_v22 = vpop.eup %77 }
 0x14f   :  { %v40_v23 = vsub.f32 1.0, %v78_v22 }
 0x151   :  { %v41_v24 = vmul.f32 %v40_v23, %v40_v23 }
 0x153   :  { %v42_v25 = vmul.f32 %v41_v24, %v36_v19 }
 0x155   :  { %v51_v26 = vsel %vm50_vm2, %v42_v25, 0.0 }
 0x156   :  { %52 = vadd.xlane.f32.xlu1 %v51_v26 }
 0x1e3   :  { %v53_v27 = vpop.xlane.xlu1 %52 }
 0x1e4   :  { %v54_v28 = vrot.slane %v53_v27, 4 }
 0x1e6   :  { %v55_v29 = vadd.f32 %v54_v28, %v53_v27 }
 0x1e8   :  { %v56_v30 = vrot.slane %v55_v29, 2 }
 0x1ea   :  { %v57_v31 = vadd.f32 %v56_v30, %v55_v29 }
 0x1ec   :  { %v58_v32 = vrot.slane %v57_v31, 1 }
 0x1ee   :  { %v59_v33 = vadd.f32 %v58_v32, %v57_v31 }
 0x1f0   :  { %69 = vpush %v59_v33 }
 0x221   :  { %s70_s0 = spop %69 }
 0x222   :  { %v62_v35 = vstv %s70_s0 }
 0x223   :  { %v63_v36 = vsel %vm61_vm3, %v62_v35, 0.0 }
 0x224   :  { %64 = vst.msk [vmem:[%s111_s2] sm:$0xff] %vm50_vm2, %v63_v36 }

</bundles_post_ra>
